<compile_context>
chip_gen: v6e
topology: v6e:2x2x1
jax: 0.10.0
libtpu: 0.0.40
codegen_flags: <defaults>
</compile_context>

<pallas_src>
import jax
import jax.numpy as jnp
from jax.experimental import pallas as pl
from jax.experimental.pallas import tpu as pltpu

LANE = 128
SUB = 8


def _round_up(x, m):
    return ((x + m - 1) // m) * m


def classification_net_kernel(
    scal_ref,   # SMEM (1, 4): [a1 (emb PReLU), ah (head PReLU), b2_0, b2_1]
    x_ref,      # VMEM (tm, D)   flattened input tile
    w1_ref,     # VMEM (D, H)    embedding layer-1 weight, (K, N) layout, VMEM-resident
    b1_ref,     # VMEM (1, H)
    w2t_ref,    # VMEM (2, H)    embedding layer-2 weight, transposed
    wfc_ref,    # VMEM (2, Cp)   fc1 weight, classes padded to lane multiple
    bfc_ref,    # VMEM (1, Cp)   fc1 bias, padded classes = -1e30
    out_ref,    # VMEM (tm, Cp)  log-softmax scores (padded)
):
    # MXU: one-shot (tm, D) @ (D, H); W1 never leaves VMEM across batch tiles.
    h = jnp.dot(x_ref[...], w1_ref[...], preferred_element_type=jnp.float32)
    h = h + b1_ref[...]                                       # (tm, H) f32

    a1 = scal_ref[0, 0]
    ah = scal_ref[0, 1]
    h = jnp.where(h > 0, h, a1 * h)                           # embedding-net PReLU

    # ---- head on the VPU/XLU (MXU-hostile shapes: N=2 then K=2) ----
    w2t = w2t_ref[...]                                        # (2, H)
    e0 = jnp.sum(h * w2t[0:1, :], axis=-1, keepdims=True) + scal_ref[0, 2]
    e1 = jnp.sum(h * w2t[1:2, :], axis=-1, keepdims=True) + scal_ref[0, 3]

    # ClassificationNet.nonlinear (PReLU on the 2-D embedding)
    e0 = jnp.where(e0 > 0, e0, ah * e0)
    e1 = jnp.where(e1 > 0, e1, ah * e1)

    # fc1 via two broadcast FMAs (K=2, lane-dense Cp output)
    wfc = wfc_ref[...]                                        # (2, Cp)
    logits = e0 * wfc[0:1, :] + e1 * wfc[1:2, :] + bfc_ref[...]

    # log_softmax (numerically stable); padded classes hold -1e30 so their
    # exp underflows to 0 and they do not perturb the result.
    m = jnp.max(logits, axis=-1, keepdims=True)
    shifted = logits - m
    lse = jnp.log(jnp.sum(jnp.exp(shifted), axis=-1, keepdims=True))
    out_ref[...] = shifted - lse


def prep_params(params, *, use_bf16=False):
    """One-time conversion of torch-layout params to kernel-ready tensors.

    Kept OUT of the per-call hot path so padding/transpose does not add HBM
    traffic to the memory-bound forward pass.
    """
    w1 = jnp.asarray(params["w1"], jnp.float32)     # (H, D) = Linear(D,H).weight
    b1 = jnp.asarray(params["b1"], jnp.float32)     # (H,)
    w2 = jnp.asarray(params["w2"], jnp.float32)     # (2, H)
    b2 = jnp.asarray(params["b2"], jnp.float32)     # (2,)
    wfc = jnp.asarray(params["wfc"], jnp.float32)   # (C, 2) = Linear(2,C).weight
    bfc = jnp.asarray(params["bfc"], jnp.float32)   # (C,)

    H, D = w1.shape
    C = wfc.shape[0]
    Cp = _round_up(C, LANE)
    mxu_dtype = jnp.bfloat16 if use_bf16 else jnp.float32

    w1_kn = w1.T.astype(mxu_dtype)                                # (D, H)
    b1_p = b1.reshape(1, H)
    wfc_p = jnp.zeros((2, Cp), jnp.float32).at[:, :C].set(wfc.T)
    bfc_p = jnp.full((1, Cp), -1e30, jnp.float32).at[0, :C].set(bfc)
    scal = jnp.stack([jnp.asarray(params["a1"], jnp.float32),
                      jnp.asarray(params["ah"], jnp.float32),
                      b2[0], b2[1]]).reshape(1, 4)

    return dict(scal=scal, w1=w1_kn, b1=b1_p, w2t=w2, wfc=wfc_p, bfc=bfc_p,
                D=D, H=H, C=C, Cp=Cp, mxu_dtype=mxu_dtype)


def classification_net_forward(x_nchw, kp, *, tm_max=512, vmem_x_budget=20 << 20):
    D, H, C, Cp = kp["D"], kp["H"], kp["C"], kp["Cp"]
    mxu_dtype = kp["mxu_dtype"]
    itemsize = jnp.dtype(mxu_dtype).itemsize

    B = x_nchw.shape[0]
    x = x_nchw.reshape(B, -1).astype(mxu_dtype)
    assert x.shape[1] == D

    # ---- batch tiling; only the batch dimension is padded (D left exact) ----
    B8 = _round_up(B, SUB)
    per_row = 2 * (D * itemsize + Cp * 4)                 # double-buffered x + out
    tm_cap = max(SUB, (vmem_x_budget // per_row) // SUB * SUB)
    tm = max(SUB, min(tm_max, B8, tm_cap))
    if B8 >= 2 * SUB:
        # >= 2 batch tiles so the "parallel" grid axis shards onto both
        # TensorCores on v7x.
        tm = min(tm, _round_up((B8 + 1) // 2, SUB))
    tm = max(SUB, (tm // SUB) * SUB)
    B_pad = _round_up(B8, tm)
    if B_pad != B:
        x = jnp.pad(x, ((0, B_pad - B), (0, 0)))

    grid = (B_pad // tm,)

    # VMEM budget: double-buffered x tile + resident W1 (lane-padded) + out.
    vmem_est = (2 * tm * D * itemsize
                + 2 * D * max(H, LANE) * itemsize
                + 2 * tm * Cp * 4
                + (2 << 20))
    vmem_limit = int(min(max(vmem_est, 32 << 20), 48 << 20))

    out_p = pl.pallas_call(
        classification_net_kernel,
        out_shape=jax.ShapeDtypeStruct((B_pad, Cp), jnp.float32),
        grid_spec=pltpu.PrefetchScalarGridSpec(
            num_scalar_prefetch=0,
            grid=grid,
            in_specs=[
                pl.BlockSpec(memory_space=pltpu.MemorySpace.SMEM),  # scalars
                pl.BlockSpec((tm, D), lambda i: (i, 0)),            # x tile
                pl.BlockSpec((D, H), lambda i: (0, 0)),             # W1 (resident)
                pl.BlockSpec((1, H), lambda i: (0, 0)),             # b1
                pl.BlockSpec((2, H), lambda i: (0, 0)),             # W2^T
                pl.BlockSpec((2, Cp), lambda i: (0, 0)),            # fc1 weight
                pl.BlockSpec((1, Cp), lambda i: (0, 0)),            # fc1 bias
            ],
            out_specs=pl.BlockSpec((tm, Cp), lambda i: (i, 0)),
        ),
        compiler_params=pltpu.CompilerParams(
            dimension_semantics=("parallel",),
            vmem_limit_bytes=vmem_limit,
        ),
    )(kp["scal"], x, kp["w1"], kp["b1"], kp["w2t"], kp["wfc"], kp["bfc"])

    return out_p[:B, :C]


def make_params(key, D, H, n_classes):
    # Torch-like layouts: Linear(in, out).weight is (out, in).
    ks = jax.random.split(key, 6)
    return dict(
        w1=jax.random.normal(ks[0], (H, D), jnp.float32) * (1.0 / jnp.sqrt(float(D))),
        b1=jax.random.normal(ks[1], (H,), jnp.float32) * 0.01,
        a1=jnp.float32(0.25),                       # PReLU default init
        w2=jax.random.normal(ks[2], (2, H), jnp.float32) * (1.0 / jnp.sqrt(float(H))),
        b2=jax.random.normal(ks[3], (2,), jnp.float32) * 0.01,
        ah=jnp.float32(0.25),                       # ClassificationNet.nonlinear
        wfc=jax.random.normal(ks[4], (n_classes, 2), jnp.float32) * (1.0 / jnp.sqrt(2.0)),
        bfc=jax.random.normal(ks[5], (n_classes,), jnp.float32) * 0.01,
    )


def reference_forward(x_nchw, params):
    # pure-JAX reference for correctness check (torch-layout params)
    x = x_nchw.reshape(x_nchw.shape[0], -1).astype(jnp.float32)
    h = x @ params["w1"].T + params["b1"]
    h = jnp.where(h > 0, h, params["a1"] * h)
    emb = h @ params["w2"].T + params["b2"]
    emb = jnp.where(emb > 0, emb, params["ah"] * emb)
    logits = emb @ params["wfc"].T + params["bfc"]
    return jax.nn.log_softmax(logits, axis=-1)


if __name__ == "__main__":
    B, Cin, Hs, Ws = 2, 4, 16, 16          # NCHW input
    hidden = 32
    n_classes = 10
    D = Cin * Hs * Ws

    key = jax.random.PRNGKey(0)
    kx, kpk = jax.random.split(key)
    x = jax.random.normal(kx, (B, Cin, Hs, Ws), jnp.float32)
    params = make_params(kpk, D, hidden, n_classes)

    # One-time parameter preparation (padding/transpose off the hot path).
    kparams = prep_params(params, use_bf16=False)

    scores = classification_net_forward(x, kparams)
    scores = jax.block_until_ready(scores)

    ref = reference_forward(x, params)
    assert scores.shape == (B, n_classes)
    assert jnp.allclose(scores, ref, atol=1e-4, rtol=1e-4), float(
        jnp.max(jnp.abs(scores - ref)))

    print("KERNEL_OK")
</pallas_src>

<mosaic_0001>
module attributes {stable_mosaic.version = 11 : i64} {
  func.func @classification_net_kernel(%arg0: i32, %arg1: memref<1x4xf32, #tpu.memory_space<smem>>, %arg2: memref<8x1024xf32, #tpu.memory_space<vmem>>, %arg3: memref<1024x32xf32, #tpu.memory_space<vmem>>, %arg4: memref<1x32xf32, #tpu.memory_space<vmem>>, %arg5: memref<2x32xf32, #tpu.memory_space<vmem>>, %arg6: memref<2x128xf32, #tpu.memory_space<vmem>>, %arg7: memref<1x128xf32, #tpu.memory_space<vmem>>, %arg8: memref<8x128xf32, #tpu.memory_space<vmem>>) attributes {dimension_semantics = [#tpu.dimension_semantics<parallel>], iteration_bounds = array<i64: 1>, scalar_prefetch = 0 : i64, scratch_operands = 0 : i64, tpu.core_type = #tpu.core_type<tc>, window_params = [{transform_indices = @transform_0, window_bounds = array<i64: 1, 4>}, {transform_indices = @transform_1, window_bounds = array<i64: 8, 1024>}, {pipeline_mode = #tpu.pipeline_mode<synchronous>, transform_indices = @transform_2, window_bounds = array<i64: 1024, 32>}, {pipeline_mode = #tpu.pipeline_mode<synchronous>, transform_indices = @transform_3, window_bounds = array<i64: 1, 32>}, {pipeline_mode = #tpu.pipeline_mode<synchronous>, transform_indices = @transform_4, window_bounds = array<i64: 2, 32>}, {pipeline_mode = #tpu.pipeline_mode<synchronous>, transform_indices = @transform_5, window_bounds = array<i64: 2, 128>}, {pipeline_mode = #tpu.pipeline_mode<synchronous>, transform_indices = @transform_6, window_bounds = array<i64: 1, 128>}, {transform_indices = @transform_7, window_bounds = array<i64: 8, 128>}]} {
    %c0 = arith.constant 0 : index
    %c0_0 = arith.constant 0 : index
    %0 = vector.load %arg2[%c0, %c0_0] : memref<8x1024xf32, #tpu.memory_space<vmem>>, vector<8x1024xf32>
    %c0_1 = arith.constant 0 : index
    %c0_2 = arith.constant 0 : index
    %1 = vector.load %arg3[%c0_1, %c0_2] : memref<1024x32xf32, #tpu.memory_space<vmem>>, vector<1024x32xf32>
    %cst = arith.constant dense<0.000000e+00> : vector<8x32xf32>
    %2 = tpu.matmul %0, %1, %cst {dimension_numbers = #tpu.dot_dimension_numbers<[1], [0], [0], [1], [0, 0, 1, 1], [], []>} : vector<8x1024xf32>, vector<1024x32xf32>, vector<8x32xf32> -> vector<8x32xf32>
    %c0_3 = arith.constant 0 : index
    %c0_4 = arith.constant 0 : index
    %3 = vector.load %arg4[%c0_3, %c0_4] : memref<1x32xf32, #tpu.memory_space<vmem>>, vector<1x32xf32>
    %4 = vector.broadcast %3 : vector<1x32xf32> to vector<8x32xf32>
    %5 = arith.addf %2, %4 : vector<8x32xf32>
    %c0_5 = arith.constant 0 : index
    %c0_6 = arith.constant 0 : index
    %6 = memref.load %arg1[%c0_5, %c0_6] : memref<1x4xf32, #tpu.memory_space<smem>>
    %c0_7 = arith.constant 0 : index
    %c1 = arith.constant 1 : index
    %7 = memref.load %arg1[%c0_7, %c1] : memref<1x4xf32, #tpu.memory_space<smem>>
    %cst_8 = arith.constant 0.000000e+00 : f32
    %8 = vector.broadcast %cst_8 : f32 to vector<8x32xf32>
    %9 = arith.cmpf ogt, %5, %8 : vector<8x32xf32>
    %10 = vector.broadcast %6 : f32 to vector<8x32xf32>
    %11 = arith.mulf %10, %5 : vector<8x32xf32>
    %12 = arith.select %9, %5, %11 : vector<8x32xi1>, vector<8x32xf32>
    %c0_9 = arith.constant 0 : index
    %c0_10 = arith.constant 0 : index
    %13 = vector.load %arg5[%c0_9, %c0_10] : memref<2x32xf32, #tpu.memory_space<vmem>>, vector<2x32xf32>
    %14 = vector.extract_strided_slice %13 {offsets = [0, 0], sizes = [1, 32], strides = [1, 1]} : vector<2x32xf32> to vector<1x32xf32>
    %15 = vector.broadcast %14 : vector<1x32xf32> to vector<8x32xf32>
    %16 = arith.mulf %12, %15 : vector<8x32xf32>
    %cst_11 = arith.constant dense<0.000000e+00> : vector<8xf32>
    %17 = vector.multi_reduction <add>, %16, %cst_11 [1] : vector<8x32xf32> to vector<8xf32>
    %18 = vector.shape_cast %17 : vector<8xf32> to vector<8x1xf32>
    %c0_12 = arith.constant 0 : index
    %c2 = arith.constant 2 : index
    %19 = memref.load %arg1[%c0_12, %c2] : memref<1x4xf32, #tpu.memory_space<smem>>
    %20 = vector.broadcast %19 : f32 to vector<8x1xf32>
    %21 = arith.addf %18, %20 : vector<8x1xf32>
    %22 = vector.extract_strided_slice %13 {offsets = [1, 0], sizes = [1, 32], strides = [1, 1]} : vector<2x32xf32> to vector<1x32xf32>
    %23 = vector.broadcast %22 : vector<1x32xf32> to vector<8x32xf32>
    %24 = arith.mulf %12, %23 : vector<8x32xf32>
    %cst_13 = arith.constant dense<0.000000e+00> : vector<8xf32>
    %25 = vector.multi_reduction <add>, %24, %cst_13 [1] : vector<8x32xf32> to vector<8xf32>
    %26 = vector.shape_cast %25 : vector<8xf32> to vector<8x1xf32>
    %c0_14 = arith.constant 0 : index
    %c3 = arith.constant 3 : index
    %27 = memref.load %arg1[%c0_14, %c3] : memref<1x4xf32, #tpu.memory_space<smem>>
    %28 = vector.broadcast %27 : f32 to vector<8x1xf32>
    %29 = arith.addf %26, %28 : vector<8x1xf32>
    %cst_15 = arith.constant 0.000000e+00 : f32
    %30 = vector.broadcast %cst_15 : f32 to vector<8x1xf32>
    %31 = arith.cmpf ogt, %21, %30 : vector<8x1xf32>
    %32 = vector.broadcast %7 : f32 to vector<8x1xf32>
    %33 = arith.mulf %32, %21 : vector<8x1xf32>
    %34 = arith.select %31, %21, %33 : vector<8x1xi1>, vector<8x1xf32>
    %cst_16 = arith.constant 0.000000e+00 : f32
    %35 = vector.broadcast %cst_16 : f32 to vector<8x1xf32>
    %36 = arith.cmpf ogt, %29, %35 : vector<8x1xf32>
    %37 = vector.broadcast %7 : f32 to vector<8x1xf32>
    %38 = arith.mulf %37, %29 : vector<8x1xf32>
    %39 = arith.select %36, %29, %38 : vector<8x1xi1>, vector<8x1xf32>
    %c0_17 = arith.constant 0 : index
    %c0_18 = arith.constant 0 : index
    %40 = vector.load %arg6[%c0_17, %c0_18] : memref<2x128xf32, #tpu.memory_space<vmem>>, vector<2x128xf32>
    %41 = vector.extract_strided_slice %40 {offsets = [0, 0], sizes = [1, 128], strides = [1, 1]} : vector<2x128xf32> to vector<1x128xf32>
    %42 = vector.broadcast %34 : vector<8x1xf32> to vector<8x128xf32>
    %43 = vector.broadcast %41 : vector<1x128xf32> to vector<8x128xf32>
    %44 = arith.mulf %42, %43 : vector<8x128xf32>
    %45 = vector.extract_strided_slice %40 {offsets = [1, 0], sizes = [1, 128], strides = [1, 1]} : vector<2x128xf32> to vector<1x128xf32>
    %46 = vector.broadcast %39 : vector<8x1xf32> to vector<8x128xf32>
    %47 = vector.broadcast %45 : vector<1x128xf32> to vector<8x128xf32>
    %48 = arith.mulf %46, %47 : vector<8x128xf32>
    %49 = arith.addf %44, %48 : vector<8x128xf32>
    %c0_19 = arith.constant 0 : index
    %c0_20 = arith.constant 0 : index
    %50 = vector.load %arg7[%c0_19, %c0_20] : memref<1x128xf32, #tpu.memory_space<vmem>>, vector<1x128xf32>
    %51 = vector.broadcast %50 : vector<1x128xf32> to vector<8x128xf32>
    %52 = arith.addf %49, %51 : vector<8x128xf32>
    %cst_21 = arith.constant dense<0xFF800000> : vector<8xf32>
    %53 = vector.multi_reduction <maximumf>, %52, %cst_21 [1] : vector<8x128xf32> to vector<8xf32>
    %54 = vector.shape_cast %53 : vector<8xf32> to vector<8x1xf32>
    %55 = vector.broadcast %54 : vector<8x1xf32> to vector<8x128xf32>
    %56 = arith.subf %52, %55 : vector<8x128xf32>
    %57 = math.exp %56 : vector<8x128xf32>
    %cst_22 = arith.constant dense<0.000000e+00> : vector<8xf32>
    %58 = vector.multi_reduction <add>, %57, %cst_22 [1] : vector<8x128xf32> to vector<8xf32>
    %59 = vector.shape_cast %58 : vector<8xf32> to vector<8x1xf32>
    %60 = math.log %59 : vector<8x1xf32>
    %61 = vector.broadcast %60 : vector<8x1xf32> to vector<8x128xf32>
    %62 = arith.subf %56, %61 : vector<8x128xf32>
    %c0_23 = arith.constant 0 : index
    %c0_24 = arith.constant 0 : index
    %63 = vector.load %arg8[%c0_23, %c0_24] : memref<8x128xf32, #tpu.memory_space<vmem>>, vector<8x128xf32>
    tpu.vector_store %arg8[%c0_23, %c0_24], %62 {strides = array<i32>} : memref<8x128xf32, #tpu.memory_space<vmem>>, vector<8x128xf32>,
    return
  }
  func.func @transform_0(%arg0: i32) -> (i32, i32) {
    %c0_i32 = arith.constant 0 : i32
    %c0_i32_0 = arith.constant 0 : i32
    %c0_i32_1 = arith.constant 0 : i32
    return %c0_i32, %c0_i32_0 : i32, i32
  }
  func.func @transform_1(%arg0: i32) -> (i32, i32) {
    %c0_i32 = arith.constant 0 : i32
    %c0_i32_0 = arith.constant 0 : i32
    return %arg0, %c0_i32 : i32, i32
  }
  func.func @transform_2(%arg0: i32) -> (i32, i32) {
    %c0_i32 = arith.constant 0 : i32
    %c0_i32_0 = arith.constant 0 : i32
    %c0_i32_1 = arith.constant 0 : i32
    return %c0_i32, %c0_i32_0 : i32, i32
  }
  func.func @transform_3(%arg0: i32) -> (i32, i32) {
    %c0_i32 = arith.constant 0 : i32
    %c0_i32_0 = arith.constant 0 : i32
    %c0_i32_1 = arith.constant 0 : i32
    return %c0_i32, %c0_i32_0 : i32, i32
  }
  func.func @transform_4(%arg0: i32) -> (i32, i32) {
    %c0_i32 = arith.constant 0 : i32
    %c0_i32_0 = arith.constant 0 : i32
    %c0_i32_1 = arith.constant 0 : i32
    return %c0_i32, %c0_i32_0 : i32, i32
  }
  func.func @transform_5(%arg0: i32) -> (i32, i32) {
    %c0_i32 = arith.constant 0 : i32
    %c0_i32_0 = arith.constant 0 : i32
    %c0_i32_1 = arith.constant 0 : i32
    return %c0_i32, %c0_i32_0 : i32, i32
  }
  func.func @transform_6(%arg0: i32) -> (i32, i32) {
    %c0_i32 = arith.constant 0 : i32
    %c0_i32_0 = arith.constant 0 : i32
    %c0_i32_1 = arith.constant 0 : i32
    return %c0_i32, %c0_i32_0 : i32, i32
  }
  func.func @transform_7(%arg0: i32) -> (i32, i32) {
    %c0_i32 = arith.constant 0 : i32
    %c0_i32_0 = arith.constant 0 : i32
    return %arg0, %c0_i32 : i32, i32
  }
}

</mosaic_0001>

<bundles_post_ra>
// kernel: tpu_custom_call.1
= control target key start
LH: loop header
LB: loop body
LE: loop exit
PB: predicated region body
PF: predicated region fallthrough
CT: control target
= control target key end

     0   :  { %12 = vsyncpa [#allocation4], 0  ;;  %s1201_s0 = inlined_call_operand.vmem [shape: f32[1,4], index: 0, kind: input, shape index: {}]   ;;  %s1202_s1 = inlined_call_operand.vmem [shape: f32[8,1024], index: 1, kind: input, shape index: {}]   ;;  %s1203_s2 = inlined_call_operand.vmem [shape: f32[1024,32], index: 2, kind: input, shape index: {}]   ;;  %s1204_s3 = inlined_call_operand.vmem [shape: f32[1,32], index: 3, kind: input, shape index: {}]   ;;  %s1205_s4 = inlined_call_operand.vmem [shape: f32[2,32], index: 4, kind: input, shape index: {}]   ;;  %s1206_s5 = inlined_call_operand.vmem [shape: f32[2,128], index: 5, kind: input, shape index: {}]   ;;  %s1207_s6 = inlined_call_operand.vmem [shape: f32[1,128], index: 6, kind: input, shape index: {}]   ;;  %s1208_s7 = inlined_call_operand.hbm [shape: f32[8,128], index: 7, kind: output, shape index: {}]  }
   0x1   :  { %13 = vsyncpa [#allocation3], 0  ;;  %s20_s26 = sshll.u32 %s1201_s0, 4  ;;  %s21_s26 = int_to_ptr.vmem [resolvable:$true] %s20_s26 }
   0x2   :  { %s697_s27 = scalar_lea.vmem %s21_s26, 16  ;;  %p702_p1 = scmp.lt.s32.totalorder %s21_s26, %s21_s26 }
   0x3   :  { %p698_p0 = scmp.ne.s32.totalorder %s21_s26, %s697_s27  ;;  %p703_p2 = scmp.lt.s32.totalorder %s697_s27, %s697_s27 }
   0x5   :  { %p704_p3 = por %p703_p2, %p702_p1 }
   0x7   :  { %p705_p4 = pnand %p704_p3, %p698_p0 }
   0x9   :  { %708 = shalt.err (!%p705_p4)
}
   0xa   :  { %s733_s28 = smov [#allocation2]  }
   0xb   :  { %23 = dma.vmem_to_smem %s21_s26, 16, %s733_s28, [#allocation4]  }
   0xc   :  { %729 = dma.done.wait [#allocation4], 16  }
   0xd   :  { %730 = vsyncadd [#allocation4], 4294967280 }
   0xe   :  { %39 = sfence }
   0xf   :  { %v79_v0 = vld [vmem:[%s1203_s2 + $0xf8] sm:$0xff]  ;;  %v78_v4 = vld [vmem:[%s1203_s2 + $0xf0] sm:$0xff]  ;;  %v77_v8 = vld [vmem:[%s1203_s2 + $0xe8] sm:$0xff]  ;;  %s463_s14 = sld [smem:[#allocation2]]  ;;  %vm475_vm1 = vcmask 261120  }
  0x10   :  { %v111_v1 = vld [vmem:[%s1203_s2 + $0x1f8] sm:$0xff]  ;;  %551 = vmatprep.subr.mxu0 %v79_v0  ;;  %v110_v5 = vld [vmem:[%s1203_s2 + $0x1f0] sm:$0xff]  ;;  %v109_v9 = vld [vmem:[%s1203_s2 + $0x1e8] sm:$0xff]  ;;  %s547_s16 = sld [smem:[#allocation2 + $0x1]] }
  0x11   :  { %v63_v2 = vld [vmem:[%s1203_s2 + $0x78] sm:$0xff]  ;;  %586 = vmatprep.subr.mxu1 %v111_v1  ;;  %v62_v6 = vld [vmem:[%s1203_s2 + $0x70] sm:$0xff]  ;;  %v61_v10 = vld [vmem:[%s1203_s2 + $0x68] sm:$0xff]  ;;  %s549_s17 = sld [smem:[#allocation2 + $0x3]] }
  0x12   :  { %v95_v3 = vld [vmem:[%s1203_s2 + $0x178] sm:$0xff]  ;;  %552 = vmatpush3.msra.mxu0 %v63_v2  ;;  %v94_v7 = vld [vmem:[%s1203_s2 + $0x170] sm:$0xff]  ;;  %v93_v11 = vld [vmem:[%s1203_s2 + $0x168] sm:$0xff] }
  0x13   :  { %587 = vmatpush3.msra.mxu1 %v95_v3  ;;  %553 = vmatprep.subr.mxu0 %v78_v4  ;;  %v76_v12 = vld [vmem:[%s1203_s2 + $0xe0] sm:$0xff]  ;;  %v75_v16 = vld [vmem:[%s1203_s2 + $0xd8] sm:$0xff]  ;;  %v74_v20 = vld [vmem:[%s1203_s2 + $0xd0] sm:$0xff] }
  0x14   :  { %588 = vmatprep.subr.mxu1 %v110_v5  ;;  %554 = vmatpush3.msra.mxu0 %v62_v6  ;;  %v108_v13 = vld [vmem:[%s1203_s2 + $0x1e0] sm:$0xff]  ;;  %v107_v17 = vld [vmem:[%s1203_s2 + $0x1d8] sm:$0xff]  ;;  %v106_v21 = vld [vmem:[%s1203_s2 + $0x1d0] sm:$0xff] }
  0x15   :  { %589 = vmatpush3.msra.mxu1 %v94_v7  ;;  %555 = vmatprep.subr.mxu0 %v77_v8  ;;  %v60_v14 = vld [vmem:[%s1203_s2 + $0x60] sm:$0xff]  ;;  %v59_v18 = vld [vmem:[%s1203_s2 + $0x58] sm:$0xff]  ;;  %v58_v22 = vld [vmem:[%s1203_s2 + $0x50] sm:$0xff] }
  0x16   :  { %590 = vmatprep.subr.mxu1 %v109_v9  ;;  %v92_v15 = vld [vmem:[%s1203_s2 + $0x160] sm:$0xff]  ;;  %556 = vmatpush3.msra.mxu0 %v61_v10  ;;  %v91_v19 = vld [vmem:[%s1203_s2 + $0x158] sm:$0xff]  ;;  %v90_v23 = vld [vmem:[%s1203_s2 + $0x150] sm:$0xff] }
  0x17   :  { %591 = vmatpush3.msra.mxu1 %v93_v11  ;;  %557 = vmatprep.subr.mxu0 %v76_v12  ;;  %v73_v24 = vld [vmem:[%s1203_s2 + $0xc8] sm:$0xff]  ;;  %v72_v28 = vld [vmem:[%s1203_s2 + $0xc0] sm:$0xff]  ;;  %v71_v32 = vld [vmem:[%s1203_s2 + $0xb8] sm:$0xff] }
  0x18   :  { %592 = vmatprep.subr.mxu1 %v108_v13  ;;  %558 = vmatpush3.msra.mxu0 %v60_v14  ;;  %v105_v25 = vld [vmem:[%s1203_s2 + $0x1c8] sm:$0xff]  ;;  %v104_v29 = vld [vmem:[%s1203_s2 + $0x1c0] sm:$0xff]  ;;  %v103_v33 = vld [vmem:[%s1203_s2 + $0x1b8] sm:$0xff] }
  0x19   :  { %593 = vmatpush3.msra.mxu1 %v92_v15  ;;  %559 = vmatprep.subr.mxu0 %v75_v16  ;;  %v57_v26 = vld [vmem:[%s1203_s2 + $0x48] sm:$0xff]  ;;  %v56_v30 = vld [vmem:[%s1203_s2 + $0x40] sm:$0xff]  ;;  %v55_v34 = vld [vmem:[%s1203_s2 + $0x38] sm:$0xff] }
  0x1a   :  { %594 = vmatprep.subr.mxu1 %v107_v17  ;;  %560 = vmatpush3.msra.mxu0 %v59_v18  ;;  %v89_v27 = vld [vmem:[%s1203_s2 + $0x148] sm:$0xff]  ;;  %v88_v31 = vld [vmem:[%s1203_s2 + $0x140] sm:$0xff]  ;;  %v87_v35 = vld [vmem:[%s1203_s2 + $0x138] sm:$0xff] }
  0x1b   :  { %595 = vmatpush3.msra.mxu1 %v91_v19  ;;  %561 = vmatprep.subr.mxu0 %v74_v20  ;;  %v70_v36 = vld [vmem:[%s1203_s2 + $0xb0] sm:$0xff]  ;;  %v69_v40 = vld [vmem:[%s1203_s2 + $0xa8] sm:$0xff]  ;;  %v68_v44 = vld [vmem:[%s1203_s2 + $0xa0] sm:$0xff] }
  0x1c   :  { %596 = vmatprep.subr.mxu1 %v106_v21  ;;  %562 = vmatpush3.msra.mxu0 %v58_v22  ;;  %v102_v37 = vld [vmem:[%s1203_s2 + $0x1b0] sm:$0xff]  ;;  %v101_v41 = vld [vmem:[%s1203_s2 + $0x1a8] sm:$0xff]  ;;  %v100_v45 = vld [vmem:[%s1203_s2 + $0x1a0] sm:$0xff] }
  0x1d   :  { %597 = vmatpush3.msra.mxu1 %v90_v23  ;;  %563 = vmatprep.subr.mxu0 %v73_v24  ;;  %v54_v38 = vld [vmem:[%s1203_s2 + $0x30] sm:$0xff]  ;;  %v53_v42 = vld [vmem:[%s1203_s2 + $0x28] sm:$0xff]  ;;  %v52_v46 = vld [vmem:[%s1203_s2 + $0x20] sm:$0xff] }
  0x1e   :  { %598 = vmatprep.subr.mxu1 %v105_v25  ;;  %564 = vmatpush3.msra.mxu0 %v57_v26  ;;  %v86_v39 = vld [vmem:[%s1203_s2 + $0x130] sm:$0xff]  ;;  %v85_v43 = vld [vmem:[%s1203_s2 + $0x128] sm:$0xff]  ;;  %v84_v47 = vld [vmem:[%s1203_s2 + $0x120] sm:$0xff] }
  0x1f   :  { %599 = vmatpush3.msra.mxu1 %v89_v27  ;;  %565 = vmatprep.subr.mxu0 %v72_v28  ;;  %v67_v48 = vld [vmem:[%s1203_s2 + $0x98] sm:$0xff]  ;;  %v66_v52 = vld [vmem:[%s1203_s2 + $0x90] sm:$0xff]  ;;  %v65_v56 = vld [vmem:[%s1203_s2 + $0x88] sm:$0xff] }
  0x20   :  { %600 = vmatprep.subr.mxu1 %v104_v29  ;;  %566 = vmatpush3.msra.mxu0 %v56_v30  ;;  %v99_v49 = vld [vmem:[%s1203_s2 + $0x198] sm:$0xff]  ;;  %v98_v53 = vld [vmem:[%s1203_s2 + $0x190] sm:$0xff]  ;;  %v97_v57 = vld [vmem:[%s1203_s2 + $0x188] sm:$0xff] }
  0x21   :  { %601 = vmatpush3.msra.mxu1 %v88_v31  ;;  %567 = vmatprep.subr.mxu0 %v71_v32  ;;  %v51_v50 = vld [vmem:[%s1203_s2 + $0x18] sm:$0xff]  ;;  %v50_v54 = vld [vmem:[%s1203_s2 + $0x10] sm:$0xff]  ;;  %v49_v58 = vld [vmem:[%s1203_s2 + $0x8] sm:$0xff] }
  0x22   :  { %602 = vmatprep.subr.mxu1 %v103_v33  ;;  %568 = vmatpush3.msra.mxu0 %v55_v34  ;;  %v83_v51 = vld [vmem:[%s1203_s2 + $0x118] sm:$0xff]  ;;  %v82_v55 = vld [vmem:[%s1203_s2 + $0x110] sm:$0xff]  ;;  %v81_v59 = vld [vmem:[%s1203_s2 + $0x108] sm:$0xff] }
  0x23   :  { %603 = vmatpush3.msra.mxu1 %v87_v35  ;;  %569 = vmatprep.subr.mxu0 %v70_v36  ;;  %v64_v60 = vld [vmem:[%s1203_s2 + $0x80] sm:$0xff]  ;;  %v41_v63 = vld [vmem:[%s1202_s1 + $0x8] sm:$0xff]  ;;  %v43_v2 = vld [vmem:[%s1202_s1 + $0x18] sm:$0xff] }
  0x24   :  { %604 = vmatprep.subr.mxu1 %v102_v37  ;;  %570 = vmatpush3.msra.mxu0 %v54_v38  ;;  %v96_v61 = vld [vmem:[%s1203_s2 + $0x180] sm:$0xff]  ;;  %v143_v3 = vld [vmem:[%s1203_s2 + $0x2f8] sm:$0xff]  ;;  %v42_v5 = vld [vmem:[%s1202_s1 + $0x10] sm:$0xff] }
  0x25   :  { %605 = vmatpush3.msra.mxu1 %v86_v39  ;;  %571 = vmatprep.subr.mxu0 %v69_v40  ;;  %v48_v62 = vld [vmem:[%s1203_s2] sm:$0xff]  ;;  %v175_v4 = vld [vmem:[%s1203_s2 + $0x3f8] sm:$0xff]  ;;  %v142_v8 = vld [vmem:[%s1203_s2 + $0x2f0] sm:$0xff] }
  0x26   :  { %606 = vmatprep.subr.mxu1 %v101_v41  ;;  %572 = vmatpush3.msra.mxu0 %v53_v42  ;;  %v80_v0 = vld [vmem:[%s1203_s2 + $0x100] sm:$0xff]  ;;  %v127_v6 = vld [vmem:[%s1203_s2 + $0x278] sm:$0xff]  ;;  %v174_v9 = vld [vmem:[%s1203_s2 + $0x3f0] sm:$0xff] }
  0x27   :  { %607 = vmatpush3.msra.mxu1 %v85_v43  ;;  %573 = vmatprep.subr.mxu0 %v68_v44  ;;  %v40_v1 = vld [vmem:[%s1202_s1] sm:$0xff]  ;;  %v159_v7 = vld [vmem:[%s1203_s2 + $0x378] sm:$0xff]  ;;  %v126_v10 = vld [vmem:[%s1203_s2 + $0x270] sm:$0xff] }
  0x28   :  { %608 = vmatprep.subr.mxu1 %v100_v45  ;;  %574 = vmatpush3.msra.mxu0 %v52_v46  ;;  %v158_v11 = vld [vmem:[%s1203_s2 + $0x370] sm:$0xff]  ;;  %v141_v12 = vld [vmem:[%s1203_s2 + $0x2e8] sm:$0xff]  ;;  %v140_v16 = vld [vmem:[%s1203_s2 + $0x2e0] sm:$0xff] }
  0x29   :  { %609 = vmatpush3.msra.mxu1 %v84_v47  ;;  %575 = vmatprep.subr.mxu0 %v67_v48  ;;  %v173_v13 = vld [vmem:[%s1203_s2 + $0x3e8] sm:$0xff]  ;;  %v172_v17 = vld [vmem:[%s1203_s2 + $0x3e0] sm:$0xff]  ;;  %v139_v20 = vld [vmem:[%s1203_s2 + $0x2d8] sm:$0xff] }
  0x2a   :  { %610 = vmatprep.subr.mxu1 %v99_v49  ;;  %576 = vmatpush3.msra.mxu0 %v51_v50  ;;  %v125_v14 = vld [vmem:[%s1203_s2 + $0x268] sm:$0xff]  ;;  %v124_v18 = vld [vmem:[%s1203_s2 + $0x260] sm:$0xff]  ;;  %v171_v21 = vld [vmem:[%s1203_s2 + $0x3d8] sm:$0xff] }
  0x2b   :  { %611 = vmatpush3.msra.mxu1 %v83_v51  ;;  %577 = vmatprep.subr.mxu0 %v66_v52  ;;  %v157_v15 = vld [vmem:[%s1203_s2 + $0x368] sm:$0xff]  ;;  %v156_v19 = vld [vmem:[%s1203_s2 + $0x360] sm:$0xff]  ;;  %v123_v22 = vld [vmem:[%s1203_s2 + $0x258] sm:$0xff] }
  0x2c   :  { %612 = vmatprep.subr.mxu1 %v98_v53  ;;  %578 = vmatpush3.msra.mxu0 %v50_v54  ;;  %v155_v23 = vld [vmem:[%s1203_s2 + $0x358] sm:$0xff]  ;;  %v138_v24 = vld [vmem:[%s1203_s2 + $0x2d0] sm:$0xff]  ;;  %v137_v28 = vld [vmem:[%s1203_s2 + $0x2c8] sm:$0xff] }
  0x2d   :  { %613 = vmatpush3.msra.mxu1 %v82_v55  ;;  %579 = vmatprep.subr.mxu0 %v65_v56  ;;  %v170_v25 = vld [vmem:[%s1203_s2 + $0x3d0] sm:$0xff]  ;;  %v169_v29 = vld [vmem:[%s1203_s2 + $0x3c8] sm:$0xff]  ;;  %v136_v32 = vld [vmem:[%s1203_s2 + $0x2c0] sm:$0xff] }
  0x2e   :  { %614 = vmatprep.subr.mxu1 %v97_v57  ;;  %580 = vmatpush3.msra.mxu0 %v49_v58  ;;  %v122_v26 = vld [vmem:[%s1203_s2 + $0x250] sm:$0xff]  ;;  %v121_v30 = vld [vmem:[%s1203_s2 + $0x248] sm:$0xff]  ;;  %v168_v33 = vld [vmem:[%s1203_s2 + $0x3c0] sm:$0xff] }
  0x2f   :  { %615 = vmatpush3.msra.mxu1 %v81_v59  ;;  %581 = vmatprep.subr.mxu0 %v64_v60  ;;  %v154_v27 = vld [vmem:[%s1203_s2 + $0x350] sm:$0xff]  ;;  %v153_v31 = vld [vmem:[%s1203_s2 + $0x348] sm:$0xff]  ;;  %v120_v34 = vld [vmem:[%s1203_s2 + $0x240] sm:$0xff] }
  0x30   :  { %616 = vmatprep.subr.mxu1 %v96_v61  ;;  %582 = vmatpush3.msra.mxu0 %v48_v62  ;;  %v152_v35 = vld [vmem:[%s1203_s2 + $0x340] sm:$0xff]  ;;  %v135_v36 = vld [vmem:[%s1203_s2 + $0x2b8] sm:$0xff]  ;;  %v134_v40 = vld [vmem:[%s1203_s2 + $0x2b0] sm:$0xff] }
  0x31   :  { %247 = vmatprep.mubr.f32.mxu0 %v41_v63  ;;  %617 = vmatpush3.msra.mxu1 %v80_v0  ;;  %v167_v37 = vld [vmem:[%s1203_s2 + $0x3b8] sm:$0xff]  ;;  %v166_v41 = vld [vmem:[%s1203_s2 + $0x3b0] sm:$0xff]  ;;  %v133_v44 = vld [vmem:[%s1203_s2 + $0x2a8] sm:$0xff] }
  0x32   :  { %248 = vmatmul.mubr.f32.vlgmr.msra.gmra.mxu0 %v40_v1  ;;  %317 = vmatprep.mubr.f32.mxu1 %v43_v2  ;;  %v119_v38 = vld [vmem:[%s1203_s2 + $0x238] sm:$0xff]  ;;  %v118_v42 = vld [vmem:[%s1203_s2 + $0x230] sm:$0xff]  ;;  %v165_v45 = vld [vmem:[%s1203_s2 + $0x3a8] sm:$0xff] }
  0x33   :  { %621 = vmatprep.subr.mxu0 %v143_v3  ;;  %656 = vmatprep.subr.mxu1 %v175_v4  ;;  %v151_v39 = vld [vmem:[%s1203_s2 + $0x338] sm:$0xff]  ;;  %v150_v43 = vld [vmem:[%s1203_s2 + $0x330] sm:$0xff]  ;;  %v117_v46 = vld [vmem:[%s1203_s2 + $0x228] sm:$0xff] }
  0x34   :  { %318 = vmatmul.mubr.f32.vlgmr.msra.gmra.mxu1 %v42_v5  ;;  %622 = vmatpush3.msra.mxu0 %v127_v6  ;;  %v149_v47 = vld [vmem:[%s1203_s2 + $0x328] sm:$0xff]  ;;  %v132_v48 = vld [vmem:[%s1203_s2 + $0x2a0] sm:$0xff]  ;;  %v131_v52 = vld [vmem:[%s1203_s2 + $0x298] sm:$0xff] }
  0x35   :  { %657 = vmatpush3.msra.mxu1 %v159_v7  ;;  %623 = vmatprep.subr.mxu0 %v142_v8  ;;  %v164_v49 = vld [vmem:[%s1203_s2 + $0x3a0] sm:$0xff]  ;;  %v163_v53 = vld [vmem:[%s1203_s2 + $0x398] sm:$0xff]  ;;  %v130_v56 = vld [vmem:[%s1203_s2 + $0x290] sm:$0xff] }
  0x36   :  { %658 = vmatprep.subr.mxu1 %v174_v9  ;;  %624 = vmatpush3.msra.mxu0 %v126_v10  ;;  %v116_v50 = vld [vmem:[%s1203_s2 + $0x220] sm:$0xff]  ;;  %v115_v54 = vld [vmem:[%s1203_s2 + $0x218] sm:$0xff]  ;;  %v162_v57 = vld [vmem:[%s1203_s2 + $0x390] sm:$0xff] }
  0x37   :  { %659 = vmatpush3.msra.mxu1 %v158_v11  ;;  %625 = vmatprep.subr.mxu0 %v141_v12  ;;  %v148_v51 = vld [vmem:[%s1203_s2 + $0x320] sm:$0xff]  ;;  %v147_v55 = vld [vmem:[%s1203_s2 + $0x318] sm:$0xff]  ;;  %v114_v58 = vld [vmem:[%s1203_s2 + $0x210] sm:$0xff] }
  0x38   :  { %660 = vmatprep.subr.mxu1 %v173_v13  ;;  %626 = vmatpush3.msra.mxu0 %v125_v14  ;;  %v146_v59 = vld [vmem:[%s1203_s2 + $0x310] sm:$0xff]  ;;  %v129_v60 = vld [vmem:[%s1203_s2 + $0x288] sm:$0xff]  ;;  %v128_v0 = vld [vmem:[%s1203_s2 + $0x280] sm:$0xff]  ;;  %v470_v14 = vlaneseq }
  0x39   :  { %661 = vmatpush3.msra.mxu1 %v157_v15  ;;  %627 = vmatprep.subr.mxu0 %v140_v16  ;;  %v161_v61 = vld [vmem:[%s1203_s2 + $0x388] sm:$0xff]  ;;  %v160_v1 = vld [vmem:[%s1203_s2 + $0x380] sm:$0xff]  ;;  %v47_v5 = vld [vmem:[%s1202_s1 + $0x38] sm:$0xff] }
  0x3a   :  { %662 = vmatprep.subr.mxu1 %v172_v17  ;;  %628 = vmatpush3.msra.mxu0 %v124_v18  ;;  %v113_v62 = vld [vmem:[%s1203_s2 + $0x208] sm:$0xff]  ;;  %v112_v2 = vld [vmem:[%s1203_s2 + $0x200] sm:$0xff]  ;;  %v46_v7 = vld [vmem:[%s1202_s1 + $0x30] sm:$0xff] }
  0x3b   :  { %663 = vmatpush3.msra.mxu1 %v156_v19  ;;  %629 = vmatprep.subr.mxu0 %v139_v20  ;;  %v145_v63 = vld [vmem:[%s1203_s2 + $0x308] sm:$0xff]  ;;  %v144_v4 = vld [vmem:[%s1203_s2 + $0x300] sm:$0xff]  ;;  %v471_v19 = vshrl.u32 %v470_v14, 7 }
  0x3c   :  { %664 = vmatprep.subr.mxu1 %v171_v21  ;;  %630 = vmatpush3.msra.mxu0 %v123_v22  ;;  %v45_v3 = vld [vmem:[%s1202_s1 + $0x28] sm:$0xff]  ;;  %v44_v6 = vld [vmem:[%s1202_s1 + $0x20] sm:$0xff] }
  0x3d   :  { %665 = vmatpush3.msra.mxu1 %v155_v23  ;;  %631 = vmatprep.subr.mxu0 %v138_v24  ;;  %v546_v12 = vld [vmem:[%s1204_s3] ss:$0 sm:$0xff]  ;;  %v472_v24 = vsub.s32 0, %v471_v19  ;;  %s548_s3 = sld [smem:[#allocation2 + $0x2]] }
  0x3e   :  { %666 = vmatprep.subr.mxu1 %v170_v25  ;;  %632 = vmatpush3.msra.mxu0 %v122_v26 }
  0x3f   :  { %667 = vmatpush3.msra.mxu1 %v154_v27  ;;  %633 = vmatprep.subr.mxu0 %v137_v28  ;;  %v469_v27 = vld [vmem:[%s1205_s4] sm:$0x3]  ;;  %v466_v28 = vstv %s463_s14 }
  0x40   :  { %668 = vmatprep.subr.mxu1 %v169_v29  ;;  %634 = vmatpush3.msra.mxu0 %v121_v30  ;;  %v484_v29 = vsub.s32 1, %v471_v19 }
  0x41   :  { %669 = vmatpush3.msra.mxu1 %v153_v31  ;;  %635 = vmatprep.subr.mxu0 %v136_v32  ;;  %v473_v31 = vrot.slane %v469_v27, %v472_v24 }
  0x42   :  { %670 = vmatprep.subr.mxu1 %v168_v33  ;;  %636 = vmatpush3.msra.mxu0 %v120_v34  ;;  %v485_v33 = vrot.slane %v469_v27, %v484_v29 }
  0x43   :  { %671 = vmatpush3.msra.mxu1 %v152_v35  ;;  %637 = vmatprep.subr.mxu0 %v135_v36 }
  0x44   :  { %672 = vmatprep.subr.mxu1 %v167_v37  ;;  %638 = vmatpush3.msra.mxu0 %v119_v38 }
  0x45   :  { %673 = vmatpush3.msra.mxu1 %v151_v39  ;;  %639 = vmatprep.subr.mxu0 %v134_v40  ;;  %v480_v39 = vstv %s548_s3  ;;  %v494_v40 = vstv %s547_s16 }
  0x46   :  { %674 = vmatprep.subr.mxu1 %v166_v41  ;;  %640 = vmatpush3.msra.mxu0 %v118_v42 }
  0x47   :  { %675 = vmatpush3.msra.mxu1 %v150_v43  ;;  %641 = vmatprep.subr.mxu0 %v133_v44  ;;  %v491_v43 = vstv %s549_s17 }
  0x48   :  { %676 = vmatprep.subr.mxu1 %v165_v45  ;;  %642 = vmatpush3.msra.mxu0 %v117_v46  ;;  %v500_v45 = vld [vmem:[%s1206_s5] sm:$0x3]  ;;  %s734_s5 = smov [#allocation5]  }
  0x49   :  { %677 = vmatpush3.msra.mxu1 %v149_v47  ;;  %643 = vmatprep.subr.mxu0 %v132_v48  ;;  %v504_v48 = vrot.slane %v500_v45, %v472_v24  ;;  %s537_s21 = sshll.u32 %s734_s5, 4  ;;  %s538_s21 = int_to_ptr.vmem [resolvable:$true] %s537_s21 }
  0x4a   :  { %678 = vmatprep.subr.mxu1 %v164_v49  ;;  %644 = vmatpush3.msra.mxu0 %v116_v50  ;;  %v509_v49 = vrot.slane %v500_v45, %v484_v29  ;;  %s709_s22 = scalar_lea.vmem %s538_s21, 128  ;;  %p714_p6 = scmp.lt.s32.totalorder %s538_s21, %s538_s21 }
  0x4b   :  { %679 = vmatpush3.msra.mxu1 %v148_v51  ;;  %645 = vmatprep.subr.mxu0 %v131_v52  ;;  %p710_p5 = scmp.ne.s32.totalorder %s538_s21, %s709_s22  ;;  %p715_p7 = scmp.lt.s32.totalorder %s709_s22, %s709_s22 }
  0x4c   :  { %680 = vmatprep.subr.mxu1 %v163_v53  ;;  %646 = vmatpush3.msra.mxu0 %v115_v54 }
  0x4d   :  { %681 = vmatpush3.msra.mxu1 %v147_v55  ;;  %647 = vmatprep.subr.mxu0 %v130_v56  ;;  %v550_v55 = vld [vmem:[%s1207_s6] ss:$0 sm:$0xff]  ;;  %p716_p8 = por %p715_p7, %p714_p6 }
  0x4e   :  { %682 = vmatprep.subr.mxu1 %v162_v57  ;;  %648 = vmatpush3.msra.mxu0 %v114_v58 }
  0x4f   :  { %683 = vmatpush3.msra.mxu1 %v146_v59  ;;  %649 = vmatprep.subr.mxu0 %v129_v60  ;;  %p717_p9 = pnand %p716_p8, %p710_p5 }
  0x50   :  { %684 = vmatprep.subr.mxu1 %v161_v61  ;;  %650 = vmatpush3.msra.mxu0 %v113_v62 }
  0x51   :  { %685 = vmatpush3.msra.mxu1 %v145_v63  ;;  %651 = vmatprep.subr.mxu0 %v128_v0 }
  0x52   :  { %686 = vmatprep.subr.mxu1 %v160_v1  ;;  %652 = vmatpush3.msra.mxu0 %v112_v2 }
  0x53   :  { %387 = vmatprep.mubr.f32.mxu0 %v45_v3  ;;  %687 = vmatpush3.msra.mxu1 %v144_v4 }
  0x54   :  { %457 = vmatprep.mubr.f32.mxu1 %v47_v5  ;;  %388 = vmatmul.mubr.f32.vlgmr.msra.gmra.mxu0 %v44_v6 }
  0x55   :  { %458 = vmatmul.mubr.f32.vlgmr.msra.gmra.mxu1 %v46_v7 }
  0xf2   :  { %v583_v8 = vpop.f32.mrf.mxu0 }
  0xf4   :  { %v618_v9 = vpop.f32.mrf.mxu1  ;;  %v584_v10 = vpop.f32.mrf.mxu0 }
  0xf5   :  { %v585_v11 = vadd.f32 %v584_v10, %v583_v8 }
  0xf6   :  { %v619_v13 = vpop.f32.mrf.mxu1 }
  0xf7   :  { %v250_v15 = vadd.f32 %v585_v11, %v546_v12  ;;  %v620_v16 = vadd.f32 %v619_v13, %v618_v9 }
  0xf9   :  { %v320_v22 = vadd.f32 %v620_v16, %v250_v15 }
 0x114   :  { %v653_v17 = vpop.f32.mrf.mxu0 }
 0x115   :  { %v688_v18 = vpop.f32.mrf.mxu1 }
 0x116   :  { %v654_v20 = vpop.f32.mrf.mxu0 }
 0x117   :  { %v689_v21 = vpop.f32.mrf.mxu1  ;;  %v655_v23 = vadd.f32 %v654_v20, %v653_v17 }
 0x118   :  { %v690_v26 = vadd.f32 %v689_v21, %v688_v18 }
 0x119   :  { %v390_v25 = vadd.f32 %v655_v23, %v320_v22 }
 0x11b   :  { %v460_v30 = vadd.f32 %v690_v26, %v390_v25 }
 0x11d   :  { %v467_v32 = vmul.f32 %v466_v28, %v460_v30  ;;  %vm465_vm0 = vcmp.gt.f32.partialorder %v460_v30, 0.0 }
 0x11f   :  { %v468_v34 = vsel %vm465_vm0, %v460_v30, %v467_v32 }
 0x120   :  { %v474_v35 = vmul.f32 %v473_v31, %v468_v34  ;;  %v486_v37 = vmul.f32 %v485_v33, %v468_v34 }
 0x122   :  { %v476_v36 = vsel %vm475_vm1, %v474_v35, 0.0  ;;  %v487_v38 = vsel %vm475_vm1, %v486_v37, 0.0 }
 0x123   :  { %477 = vadd.xlane.f32.xlu0 %v476_v36 }
 0x127   :  { %488 = vadd.xlane.f32.xlu0 %v487_v38 }
 0x1ac   :  { %v478_v41 = vpop.xlane.xlu0 %477 }
 0x1ad   :  { %v481_v42 = vadd.f32 %v480_v39, %v478_v41 }
 0x1af   :  { %v495_v44 = vmul.f32 %v494_v40, %v481_v42  ;;  %vm493_vm2 = vcmp.gt.f32.partialorder %v481_v42, 0.0 }
 0x1b0   :  { %v489_v46 = vpop.xlane.xlu0 %488 }
 0x1b1   :  { %v492_v47 = vadd.f32 %v491_v43, %v489_v46  ;;  %v496_v50 = vsel %vm493_vm2, %v481_v42, %v495_v44 }
 0x1b2   :  { %v505_v53 = vmul.f32 %v504_v48, %v496_v50 }
 0x1b3   :  { %vm497_vm3 = vcmp.gt.f32.partialorder %v492_v47, 0.0  ;;  %v498_v51 = vmul.f32 %v494_v40, %v492_v47 }
 0x1b5   :  { %v499_v52 = vsel %vm497_vm3, %v492_v47, %v498_v51 }
 0x1b6   :  { %v510_v54 = vmul.f32 %v509_v49, %v499_v52 }
 0x1b8   :  { %v511_v56 = vadd.f32 %v510_v54, %v505_v53 }
 0x1ba   :  { %v519_v57 = vadd.f32 %v550_v55, %v511_v56 }
 0x1bc   :  { %520 = vmax.xlane.f32.xlu1 %v519_v57 }
 0x245   :  { %v521_v58 = vpop.xlane.xlu1 %520 }
 0x246   :  { %v522_v59 = vsub.f32 %v519_v57, %v521_v58 }
 0x248   :  { %v523_v60 = vmul.f32 1.442695, %v522_v59 }
 0x24a   :  { %693 = vpow2.f32 %v523_v60 }
 0x257   :  { %v694_v61 = vpop.eup %693 }
 0x258   :  { %525 = vadd.xlane.f32.xlu1 %v694_v61 }
 0x2e1   :  { %v526_v62 = vpop.xlane.xlu1 %525 }
 0x2e2   :  { %695 = vlog2.f32 %v526_v62 }
 0x2ef   :  { %v696_v63 = vpop.eup %695 }
 0x2f0   :  { %v528_v0 = vmul.f32 0.6931472, %v696_v63 }
 0x2f2   :  { %v529_v1 = vsub.f32 %v522_v59, %v528_v0 }
 0x2f4   :  { %530 = vst [vmem:[#allocation5] sm:$0xff] %v529_v1 }
 0x2f5   :  { %720 = shalt.err (!%p717_p9)
}
 0x2f6   :  { %540 = dma.vmem_to_hbm [thread:$0]  %s538_s21, 128, %s1208_s7, [#allocation3]  }
 0x2f7   :  { %731 = dma.done.wait [#allocation3], 128  }
 0x2f8   :  { %732 = vsyncadd [#allocation3], 4294967168 }
 0x2f9   :  { %544 = vsyncpa [#allocation3], 1 }
 0x2fa   :  { %545 = vsyncpa [#allocation4], 1 }

</bundles_post_ra>
